<compile_context>
chip_gen: v7x
topology: tpu7x:2x2x1
jax: 0.10.0
libtpu: 0.0.40
codegen_flags: <defaults>
</compile_context>

<pallas_src>
import functools

import jax
import jax.numpy as jnp
from jax.experimental import pallas as pl
from jax.experimental.pallas import tpu as pltpu

BN_EPS = 1e-5

# Aggregation-matmul tile targets (clamped / adjusted per problem size).
TM_AGG = 1024   # row tile over nodes
TK_AGG = 512    # reduction tile over nodes


def _round_up(x, m):
    return ((x + m - 1) // m) * m


def _pad2d(x, rows, cols):
    r, c = x.shape
    if r == rows and c == cols:
        return x
    return jnp.pad(x, ((0, rows - r), (0, cols - c)))


def _agg_geometry(n):
    """Padded node count and (tm, tk) tiles for the N^2 aggregation matmul."""
    if n >= 512:
        tk = TK_AGG
    elif n >= 256:
        tk = 256
    else:
        tk = 128
    np_ = _round_up(n, tk)
    tm = min(TM_AGG, np_)
    while tm > tk and np_ % tm != 0:
        tm //= 2
    # v7x megacore: keep >= 2 tiles on the 'parallel' i axis when possible.
    if np_ // tm < 2:
        half = np_ // 2
        if half >= 128 and half % 128 == 0 and np_ % half == 0:
            tm = half
    return np_, tm, tk


# --------------------------------------------------------------------------
# Tiled matmul kernels (P1 pipelining + P3 accumulator pattern)
# --------------------------------------------------------------------------
def _mm_kernel(x_ref, y_ref, o_ref, acc_ref):
    @pl.when(pl.program_id(2) == 0)
    def _():
        acc_ref[...] = jnp.zeros_like(acc_ref)

    acc_ref[...] += jnp.dot(x_ref[...], y_ref[...],
                            preferred_element_type=jnp.float32)

    @pl.when(pl.program_id(2) == pl.num_programs(2) - 1)
    def _():
        o_ref[...] = acc_ref[...].astype(o_ref.dtype)


def _mm_epilogue_kernel(x_ref, y_ref, scale_ref, shift_ref, o_ref, acc_ref, *,
                        relu):
    @pl.when(pl.program_id(2) == 0)
    def _():
        acc_ref[...] = jnp.zeros_like(acc_ref)

    acc_ref[...] += jnp.dot(x_ref[...], y_ref[...],
                            preferred_element_type=jnp.float32)

    @pl.when(pl.program_id(2) == pl.num_programs(2) - 1)
    def _():
        z = acc_ref[...] * scale_ref[...] + shift_ref[...]
        if relu:
            z = jnp.maximum(z, 0.0)
        o_ref[...] = z.astype(o_ref.dtype)


def pallas_matmul_padded(x, y, *, scale=None, shift=None, relu=False,
                         out_dtype=jnp.float32, tm, tn, tk):
    """out = x @ y on pre-padded, tile-aligned operands (no pad/slice copies).

    Optionally fuses a per-output-column scale/shift (+ ReLU) epilogue.
    Returns the padded (m, n) result.
    """
    m, k = x.shape
    k2, n = y.shape
    assert k == k2, (x.shape, y.shape)
    assert m % tm == 0 and n % tn == 0 and k % tk == 0, \
        (x.shape, y.shape, tm, tn, tk)

    grid = (m // tm, n // tn, k // tk)
    x_spec = pl.BlockSpec((tm, tk), lambda i, j, kk: (i, kk))
    y_spec = pl.BlockSpec((tk, tn), lambda i, j, kk: (kk, j))
    o_spec = pl.BlockSpec((tm, tn), lambda i, j, kk: (i, j))
    scratch = [pltpu.VMEM((tm, tn), jnp.float32)]
    cparams = pltpu.CompilerParams(
        dimension_semantics=("parallel", "parallel", "arbitrary"))

    if scale is None:
        return pl.pallas_call(
            _mm_kernel,
            out_shape=jax.ShapeDtypeStruct((m, n), out_dtype),
            grid_spec=pltpu.PrefetchScalarGridSpec(
                num_scalar_prefetch=0, grid=grid,
                in_specs=[x_spec, y_spec], out_specs=o_spec,
                scratch_shapes=scratch),
            compiler_params=cparams,
        )(x, y)

    v_spec = pl.BlockSpec((1, tn), lambda i, j, kk: (0, j))
    return pl.pallas_call(
        functools.partial(_mm_epilogue_kernel, relu=relu),
        out_shape=jax.ShapeDtypeStruct((m, n), out_dtype),
        grid_spec=pltpu.PrefetchScalarGridSpec(
            num_scalar_prefetch=0, grid=grid,
            in_specs=[x_spec, y_spec, v_spec, v_spec], out_specs=o_spec,
            scratch_shapes=scratch),
        compiler_params=cparams,
    )(x, y, scale, shift)


# --------------------------------------------------------------------------
# GCN layer / network
# --------------------------------------------------------------------------
def fold_params(params, n_layers):
    """Pad weights (bf16) and fold bias + eval-mode BN into zero-padded
    per-channel f32 scale/shift."""
    folded = []
    for i, p in enumerate(params):
        in_dim, out_dim = p["w"].shape
        in_p, out_p = _round_up(in_dim, 128), _round_up(out_dim, 128)
        if i < n_layers - 1:
            scale = p["gamma"] * jax.lax.rsqrt(p["var"] + BN_EPS)
            shift = p["beta"] + (p["b"] - p["mean"]) * scale
        else:
            scale = jnp.ones_like(p["b"])
            shift = p["b"]
        folded.append(dict(
            in_dim=in_dim, out_dim=out_dim, in_p=in_p, out_p=out_p,
            w=_pad2d(p["w"], in_p, out_p).astype(jnp.bfloat16),
            scale=_pad2d(scale.reshape(1, -1).astype(jnp.float32), 1, out_p),
            shift=_pad2d(shift.reshape(1, -1).astype(jnp.float32), 1, out_p)))
    return folded


def gcn_layer(a_p, h, p, *, relu, out_dtype, tm_agg, tk_agg):
    """One GraphConv (+ folded bias/BN + optional ReLU) on padded operands."""
    w, scale, shift = p["w"], p["scale"], p["shift"]
    in_p, out_p = p["in_p"], p["out_p"]
    if p["in_dim"] <= p["out_dim"]:
        # Aggregate first (N^2 matmul over the smaller feature dim), transform after.
        ah = pallas_matmul_padded(a_p, h, out_dtype=jnp.bfloat16,
                                  tm=tm_agg, tn=in_p, tk=tk_agg)
        z = pallas_matmul_padded(ah, w, scale=scale, shift=shift, relu=relu,
                                 out_dtype=out_dtype,
                                 tm=tm_agg, tn=out_p, tk=in_p)
    else:
        # Transform first, then aggregate (both bf16-streamed).
        hw = pallas_matmul_padded(h, w, out_dtype=jnp.bfloat16,
                                  tm=tm_agg, tn=out_p, tk=in_p)
        z = pallas_matmul_padded(a_p, hw, scale=scale, shift=shift, relu=relu,
                                 out_dtype=out_dtype,
                                 tm=tm_agg, tn=out_p, tk=tk_agg)
    return z


def ogb_gcn_forward(a_hat, feat, params):
    """params: list of dicts per layer with keys w, b, gamma, beta, mean, var."""
    n = a_hat.shape[0]
    n_classes = params[-1]["w"].shape[1]
    n_layers = len(params)

    np_, tm_agg, tk_agg = _agg_geometry(n)

    # Pad + bf16-cast the adjacency ONCE (dominant operand, streamed per layer).
    a_p = _pad2d(a_hat, np_, np_).astype(jnp.bfloat16)

    folded = fold_params(params, n_layers)

    # Pad + bf16-cast the features ONCE; h stays padded (and bf16) between
    # layers, sliced only at the very end.  Padded rows/cols of h are harmless:
    # A_hat's padded rows/cols are zero and scale/shift are zero-padded.
    h = _pad2d(feat, np_, folded[0]["in_p"]).astype(jnp.bfloat16)
    # dropout0: eval mode -> identity

    for i, p in enumerate(folded):
        last = i == n_layers - 1
        h = gcn_layer(a_p, h, p, relu=not last,
                      out_dtype=jnp.float32 if last else jnp.bfloat16,
                      tm_agg=tm_agg, tk_agg=tk_agg)
        # dropout: eval mode -> identity
    return h[:n, :n_classes]


# --------------------------------------------------------------------------
# Deterministic test data + references
# --------------------------------------------------------------------------
def build_params(key, in_feats, n_hidden, n_classes, n_layers):
    params = []
    for i in range(n_layers):
        in_h = n_hidden if i > 0 else in_feats
        out_h = n_hidden if i < n_layers - 1 else n_classes
        key, kw, kg, kb, kbias = jax.random.split(key, 5)
        scl = jnp.sqrt(2.0 / (in_h + out_h))
        w = jax.random.normal(kw, (in_h, out_h), jnp.float32) * scl
        if i == n_layers - 1:   # GraphConv bias only on the last layer
            bias = jax.random.normal(kbias, (1, out_h), jnp.float32) * 0.01
        else:
            bias = jnp.zeros((1, out_h), jnp.float32)
        # BatchNorm1d (eval-mode) parameters — only used on non-final layers.
        gamma = 1.0 + 0.05 * jax.random.normal(kg, (1, out_h), jnp.float32)
        beta = 0.05 * jax.random.normal(kb, (1, out_h), jnp.float32)
        mean = jnp.zeros((1, out_h), jnp.float32)
        var = jnp.ones((1, out_h), jnp.float32)
        params.append(dict(w=w, b=bias, gamma=gamma, beta=beta,
                           mean=mean, var=var))
    return params


def build_norm_adj(key, n_nodes):
    # Random undirected graph with self-loops, normalized like DGL GraphConv 'both'.
    a = (jax.random.uniform(key, (n_nodes, n_nodes)) < 0.1).astype(jnp.float32)
    a = jnp.maximum(a, a.T)
    a = jnp.maximum(a, jnp.eye(n_nodes, dtype=jnp.float32))  # self-loops
    deg = jnp.clip(a.sum(axis=1), 1.0, None)
    d_inv_sqrt = 1.0 / jnp.sqrt(deg)
    return a * d_inv_sqrt[:, None] * d_inv_sqrt[None, :]


def reference_matched(a_hat, feat, params):
    """Pure-jnp reference mirroring the kernel numerics (bf16 inputs, f32 acc,
    bf16 inter-layer activations)."""
    n_layers = len(params)
    a = a_hat.astype(jnp.bfloat16)
    h = feat.astype(jnp.bfloat16)
    for i, p in enumerate(params):
        last = i == n_layers - 1
        w = p["w"].astype(jnp.bfloat16)
        if not last:
            scale = p["gamma"] * jax.lax.rsqrt(p["var"] + BN_EPS)
            shift = p["beta"] + (p["b"] - p["mean"]) * scale
        else:
            scale = jnp.ones_like(p["b"])
            shift = p["b"]
        in_dim, out_dim = p["w"].shape
        if in_dim <= out_dim:
            ah = jnp.dot(a, h, preferred_element_type=jnp.float32).astype(jnp.bfloat16)
            z = jnp.dot(ah, w, preferred_element_type=jnp.float32)
        else:
            hw = jnp.dot(h, w, preferred_element_type=jnp.float32).astype(jnp.bfloat16)
            z = jnp.dot(a, hw, preferred_element_type=jnp.float32)
        z = z * scale + shift
        if not last:
            z = jnp.maximum(z, 0.0)
            h = z.astype(jnp.bfloat16)
        else:
            h = z
    return h


def reference_f32(a_hat, feat, params):
    """Pure f32 module semantics (GraphConv + BN(eval) + ReLU)."""
    h = feat
    n_layers = len(params)
    for i, p in enumerate(params):
        h = a_hat @ (h @ p["w"]) + p["b"]
        if i < n_layers - 1:
            h = (h - p["mean"]) / jnp.sqrt(p["var"] + BN_EPS) * p["gamma"] + p["beta"]
            h = jnp.maximum(h, 0.0)
    return h


if __name__ == "__main__":
    N, IN_FEATS, N_HIDDEN, N_CLASSES, N_LAYERS = 64, 16, 32, 8, 3

    key = jax.random.PRNGKey(0)
    k_graph, k_feat, k_param = jax.random.split(key, 3)

    a_hat = build_norm_adj(k_graph, N)
    feat = jax.random.normal(k_feat, (N, IN_FEATS), jnp.float32)
    params = build_params(k_param, IN_FEATS, N_HIDDEN, N_CLASSES, N_LAYERS)

    out = jax.block_until_ready(ogb_gcn_forward(a_hat, feat, params))
    assert out.shape == (N, N_CLASSES)

    # Tight check against a reference with identical numerics (bf16 streams, f32 acc).
    ref_m = reference_matched(a_hat, feat, params)
    assert jnp.allclose(out, ref_m, atol=2e-2, rtol=2e-2), "mismatch vs matched reference"

    # Loose check against the pure-f32 module semantics (bf16 approximation).
    ref32 = reference_f32(a_hat, feat, params)
    assert jnp.allclose(out, ref32, atol=1e-1, rtol=1e-1), "mismatch vs f32 reference"

    print("KERNEL_OK")
</pallas_src>

<mosaic_0001>
module attributes {stable_mosaic.version = 11 : i64} {
  func.func @_mm_kernel(%arg0: i32, %arg1: i32, %arg2: i32, %arg3: memref<128x128xbf16, #tpu.memory_space<vmem>>, %arg4: memref<128x128xbf16, #tpu.memory_space<vmem>>, %arg5: memref<128x128xbf16, #tpu.memory_space<vmem>>, %arg6: memref<128x128xf32, #tpu.memory_space<vmem>>) attributes {dimension_semantics = [#tpu.dimension_semantics<parallel>, #tpu.dimension_semantics<parallel>, #tpu.dimension_semantics<arbitrary>], iteration_bounds = array<i64: 1, 1, 1>, scalar_prefetch = 0 : i64, scratch_operands = 1 : i64, tpu.core_type = #tpu.core_type<tc>, window_params = [{transform_indices = @transform_0, window_bounds = array<i64: 128, 128>}, {transform_indices = @transform_1, window_bounds = array<i64: 128, 128>}, {transform_indices = @transform_2, window_bounds = array<i64: 128, 128>}]} {
    %c0_i32 = arith.constant 0 : i32
    %0 = arith.cmpi eq, %arg2, %c0_i32 : i32
    %1 = arith.extui %0 : i1 to i32
    %c0_i32_0 = arith.constant 0 : i32
    %2 = arith.cmpi ne, %1, %c0_i32_0 : i32
    scf.if %2 {
      %cst_10 = arith.constant 0.000000e+00 : f32
      %12 = vector.broadcast %cst_10 : f32 to vector<128x128xf32>
      %c0_11 = arith.constant 0 : index
      %c0_12 = arith.constant 0 : index
      %13 = vector.load %arg6[%c0_11, %c0_12] : memref<128x128xf32, #tpu.memory_space<vmem>>, vector<128x128xf32>
      tpu.vector_store %arg6[%c0_11, %c0_12], %12 {strides = array<i32>} : memref<128x128xf32, #tpu.memory_space<vmem>>, vector<128x128xf32>,
    } else {
    }
    %c0 = arith.constant 0 : index
    %c0_1 = arith.constant 0 : index
    %3 = vector.load %arg6[%c0, %c0_1] : memref<128x128xf32, #tpu.memory_space<vmem>>, vector<128x128xf32>
    %c0_2 = arith.constant 0 : index
    %c0_3 = arith.constant 0 : index
    %4 = vector.load %arg3[%c0_2, %c0_3] : memref<128x128xbf16, #tpu.memory_space<vmem>>, vector<128x128xbf16>
    %c0_4 = arith.constant 0 : index
    %c0_5 = arith.constant 0 : index
    %5 = vector.load %arg4[%c0_4, %c0_5] : memref<128x128xbf16, #tpu.memory_space<vmem>>, vector<128x128xbf16>
    %cst = arith.constant dense<0.000000e+00> : vector<128x128xf32>
    %6 = tpu.matmul %4, %5, %cst {dimension_numbers = #tpu.dot_dimension_numbers<[1], [0], [0], [1], [0, 0, 1, 1], [], []>} : vector<128x128xbf16>, vector<128x128xbf16>, vector<128x128xf32> -> vector<128x128xf32>
    %7 = arith.addf %3, %6 : vector<128x128xf32>
    %c0_6 = arith.constant 0 : index
    %c0_7 = arith.constant 0 : index
    %8 = vector.load %arg6[%c0_6, %c0_7] : memref<128x128xf32, #tpu.memory_space<vmem>>, vector<128x128xf32>
    tpu.vector_store %arg6[%c0_6, %c0_7], %7 {strides = array<i32>} : memref<128x128xf32, #tpu.memory_space<vmem>>, vector<128x128xf32>,
    %c0_i32_8 = arith.constant 0 : i32
    %9 = arith.cmpi eq, %arg2, %c0_i32_8 : i32
    %10 = arith.extui %9 : i1 to i32
    %c0_i32_9 = arith.constant 0 : i32
    %11 = arith.cmpi ne, %10, %c0_i32_9 : i32
    scf.if %11 {
      %c0_10 = arith.constant 0 : index
      %c0_11 = arith.constant 0 : index
      %12 = vector.load %arg6[%c0_10, %c0_11] : memref<128x128xf32, #tpu.memory_space<vmem>>, vector<128x128xf32>
      %13 = arith.truncf %12 : vector<128x128xf32> to vector<128x128xbf16>
      %c0_12 = arith.constant 0 : index
      %c0_13 = arith.constant 0 : index
      %14 = vector.load %arg5[%c0_12, %c0_13] : memref<128x128xbf16, #tpu.memory_space<vmem>>, vector<128x128xbf16>
      tpu.vector_store %arg5[%c0_12, %c0_13], %13 {strides = array<i32>} : memref<128x128xbf16, #tpu.memory_space<vmem>>, vector<128x128xbf16>,
    } else {
    }
    return
  }
  func.func @transform_0(%arg0: i32, %arg1: i32, %arg2: i32) -> (i32, i32) {
    %c0_i32 = arith.constant 0 : i32
    return %arg0, %arg2 : i32, i32
  }
  func.func @transform_1(%arg0: i32, %arg1: i32, %arg2: i32) -> (i32, i32) {
    %c0_i32 = arith.constant 0 : i32
    return %arg2, %arg1 : i32, i32
  }
  func.func @transform_2(%arg0: i32, %arg1: i32, %arg2: i32) -> (i32, i32) {
    %c0_i32 = arith.constant 0 : i32
    return %arg0, %arg1 : i32, i32
  }
}

</mosaic_0001>

<bundles_post_ra>
// kernel: tpu_custom_call.1
= control target key start
LH: loop header
LB: loop body
LE: loop exit
PB: predicated region body
PF: predicated region fallthrough
CT: control target
= control target key end

     0   :  { %7 = vsyncpa [#allocation4], 0  ;;  %s768_s0 = inlined_call_operand.hbm [shape: bf16[128,128], index: 0, kind: input, shape index: {}]   ;;  %s769_s1 = inlined_call_operand.hbm [shape: bf16[128,128], index: 1, kind: input, shape index: {}]   ;;  %s770_s2 = inlined_call_operand.hbm [shape: bf16[128,128], index: 2, kind: output, shape index: {}]  }
   0x1   :  { %8 = vsyncpa [#allocation7], 0 }
   0x2   :  { %9 = vsyncpa [#allocation5], 0  ;;  %s703_s9 = smov [#allocation3]   ;;  %s631_s13 = scalar_lea.hbm %s768_s0, 1024 }
   0x3   :  { %s15_s10 = sshll.u32 %s703_s9, 4  ;;  %p632_p0 = scmp.ne.s32.totalorder %s768_s0, %s631_s13  ;;  %s16_s10 = int_to_ptr.vmem [resolvable:$true] %s15_s10 }
   0x4   :  { %p635_p1 = scmp.lt.u32.totalorder %s631_s13, %s768_s0 }
   0x6   :  { %p637_p2 = pnand %p635_p1, %p632_p0 }
   0x8   :  { %640 = shalt.err (!%p637_p2)
}
   0x9   :  { %s641_s18 = scalar_lea.vmem %s16_s10, 1024  ;;  %p646_p4 = scmp.lt.s32.totalorder %s16_s10, %s16_s10 }
   0xa   :  { %p642_p3 = scmp.ne.s32.totalorder %s16_s10, %s641_s18  ;;  %p647_p5 = scmp.lt.s32.totalorder %s641_s18, %s641_s18 }
   0xc   :  { %p648_p6 = por %p647_p5, %p646_p4 }
   0xe   :  { %p649_p7 = pnand %p648_p6, %p642_p3 }
  0x10   :  { %652 = shalt.err (!%p649_p7)
}
  0x11   :  { %s704_s19 = smov 64   ;;  %s705_s20 = smov 4  }
  0x12   :  { %21 = dma.hbm_to_vmem [thread:$0]  %s768_s0, 1024, %s16_s10, [#allocation4], %s704_s19, %s704_s19, %s705_s20  }
  0x13   :  { %s706_s23 = smov [#allocation6]   ;;  %s653_s27 = scalar_lea.hbm %s769_s1, 1024 }
  0x14   :  { %s27_s24 = sshll.u32 %s706_s23, 4  ;;  %p654_p8 = scmp.ne.s32.totalorder %s769_s1, %s653_s27  ;;  %s28_s24 = int_to_ptr.vmem [resolvable:$true] %s27_s24 }
  0x15   :  { %p657_p9 = scmp.lt.u32.totalorder %s653_s27, %s769_s1 }
  0x17   :  { %p659_p10 = pnand %p657_p9, %p654_p8 }
  0x19   :  { %662 = shalt.err (!%p659_p10)
}
  0x1a   :  { %s663_s4 = scalar_lea.vmem %s28_s24, 1024  ;;  %p668_p12 = scmp.lt.s32.totalorder %s28_s24, %s28_s24 }
  0x1b   :  { %p664_p11 = scmp.ne.s32.totalorder %s28_s24, %s663_s4  ;;  %p669_p13 = scmp.lt.s32.totalorder %s663_s4, %s663_s4 }
  0x1d   :  { %p670_p0 = por %p669_p13, %p668_p12 }
  0x1f   :  { %p671_p1 = pnand %p670_p0, %p664_p11 }
  0x21   :  { %674 = shalt.err (!%p671_p1)
}
  0x22   :  { %33 = dma.hbm_to_vmem [thread:$0]  %s769_s1, 1024, %s28_s24, [#allocation7], %s704_s19, %s704_s19, %s705_s20  }
  0x23   :  { %697 = dma.done.wait [#allocation4], 1024  }
  0x24   :  { %698 = vsyncadd [#allocation4], 4294966272 }
  0x25   :  { %699 = dma.done.wait [#allocation7], 1024  }
  0x26   :  { %700 = vsyncadd [#allocation7], 4294966272  ;;  %v615_v0 = vld [vmem:[#allocation6] sm:$0xff]   ;;  %v616_v1 = vld [vmem:[#allocation6 + $0x8] sm:$0xff]   ;;  %s707_s1 = smov [#allocation8]  }
  0x27   :  { %562 = vmatprep.subr.bf16.mxu0 %v615_v0  ;;  %594 = vmatprep.subr.bf16.mxu1 %v615_v0  ;;  %v617_v2 = vld [vmem:[#allocation6 + $0x10] sm:$0xff]   ;;  %v618_v3 = vld [vmem:[#allocation6 + $0x18] sm:$0xff]   ;;  %v623_v4 = vld [vmem:[#allocation3] sm:$0xff]   ;;  %s438_s6 = sshll.u32 %s707_s1, 4  ;;  %s439_s6 = int_to_ptr.vmem [resolvable:$true] %s438_s6 }
  0x28   :  { %563 = vmatpush3.bf16.msra.mxu0 %v615_v0  ;;  %602 = vmatpush3.bf16.msra.mxu1 %v615_v0  ;;  %v624_v5 = vld [vmem:[#allocation3 + $0x20] sm:$0xff]   ;;  %v620_v7 = vld [vmem:[#allocation6 + $0x28] sm:$0xff]   ;;  %v621_v8 = vld [vmem:[#allocation6 + $0x30] sm:$0xff]   ;;  %s675_s7 = scalar_lea.vmem %s439_s6, 1024  ;;  %p680_p3 = scmp.lt.s32.totalorder %s439_s6, %s439_s6 }
  0x29   :  { %564 = vmatprep.subr.bf16.mxu0 %v616_v1  ;;  %595 = vmatprep.subr.bf16.mxu1 %v616_v1  ;;  %v619_v6 = vld [vmem:[#allocation6 + $0x20] sm:$0xff]   ;;  %v622_v9 = vld [vmem:[#allocation6 + $0x38] sm:$0xff]   ;;  %v625_v10 = vld [vmem:[#allocation3 + $0x8] sm:$0xff]   ;;  %p676_p2 = scmp.ne.s32.totalorder %s439_s6, %s675_s7  ;;  %p681_p4 = scmp.lt.s32.totalorder %s675_s7, %s675_s7 }
  0x2a   :  { %578 = vmatprep.mubr.bf16.mxu0 %v623_v4  ;;  %586 = vmatprep.mubr.bf16.mxu1 %v624_v5  ;;  %v626_v11 = vld [vmem:[#allocation3 + $0x28] sm:$0xff]   ;;  %v627_v12 = vld [vmem:[#allocation3 + $0x10] sm:$0xff]   ;;  %v629_v14 = vld [vmem:[#allocation3 + $0x18] sm:$0xff]  }
  0x2b   :  { %v628_v13 = vld [vmem:[#allocation3 + $0x30] sm:$0xff]   ;;  %v630_v15 = vld [vmem:[#allocation3 + $0x38] sm:$0xff]   ;;  %p682_p5 = por %p681_p4, %p680_p3 }
  0x2c   :  { %565 = vmatpush3.bf16.msra.mxu0 %v616_v1  ;;  %603 = vmatpush3.bf16.msra.mxu1 %v616_v1 }
  0x2d   :  { %566 = vmatprep.subr.bf16.mxu0 %v617_v2  ;;  %596 = vmatprep.subr.bf16.mxu1 %v617_v2  ;;  %p683_p6 = pnand %p682_p5, %p676_p2 }
  0x30   :  { %567 = vmatpush3.bf16.msra.mxu0 %v617_v2  ;;  %604 = vmatpush3.bf16.msra.mxu1 %v617_v2 }
  0x31   :  { %568 = vmatprep.subr.bf16.mxu0 %v618_v3  ;;  %597 = vmatprep.subr.bf16.mxu1 %v618_v3 }
  0x34   :  { %569 = vmatpush3.bf16.msra.mxu0 %v618_v3  ;;  %605 = vmatpush3.bf16.msra.mxu1 %v618_v3 }
  0x35   :  { %570 = vmatprep.subr.bf16.mxu0 %v619_v6  ;;  %598 = vmatprep.subr.bf16.mxu1 %v619_v6 }
  0x38   :  { %571 = vmatpush3.bf16.msra.mxu0 %v619_v6  ;;  %606 = vmatpush3.bf16.msra.mxu1 %v619_v6 }
  0x39   :  { %572 = vmatprep.subr.bf16.mxu0 %v620_v7  ;;  %599 = vmatprep.subr.bf16.mxu1 %v620_v7 }
  0x3c   :  { %573 = vmatpush3.bf16.msra.mxu0 %v620_v7  ;;  %607 = vmatpush3.bf16.msra.mxu1 %v620_v7 }
  0x3d   :  { %574 = vmatprep.subr.bf16.mxu0 %v621_v8  ;;  %600 = vmatprep.subr.bf16.mxu1 %v621_v8 }
  0x40   :  { %575 = vmatpush3.bf16.msra.mxu0 %v621_v8  ;;  %608 = vmatpush3.bf16.msra.mxu1 %v621_v8 }
  0x41   :  { %576 = vmatprep.subr.bf16.mxu0 %v622_v9  ;;  %601 = vmatprep.subr.bf16.mxu1 %v622_v9 }
  0x44   :  { %577 = vmatpush3.bf16.msra.mxu0 %v622_v9  ;;  %609 = vmatpush3.bf16.msra.mxu1 %v622_v9 }
  0x47   :  { %579 = vmatmul.mubr.bf16.vlgmr.msra.gmra.mrb[0].mxu0 %v625_v10  ;;  %587 = vmatmul.mubr.bf16.vlgmr.msra.gmra.mrb[0].mxu1 %v626_v11 }
  0x48   :  { %582 = vmatprep.mubr.bf16.mxu0 %v627_v12  ;;  %590 = vmatprep.mubr.bf16.mxu1 %v628_v13 }
  0x4f   :  { %583 = vmatmul.mubr.bf16.gmra.mrb[4].mxu0 %v629_v14  ;;  %591 = vmatmul.mubr.bf16.gmra.mrb[4].mxu1 %v630_v15 }
 0x11a   :  { %v580_v16 = vpop.f32.mrb[0].mxu0  ;;  %v588_v17 = vpop.f32.mrb[0].mxu1 }
 0x11b   :  { %v239_v18 = vpop.f32.mrb[1].mxu0  ;;  %v271_v19 = vpop.f32.mrb[1].mxu1 }
 0x11c   :  { %v581_v20 = vpop.f32.mrb[2].mxu0  ;;  %v589_v21 = vpop.f32.mrb[2].mxu1 }
 0x11d   :  { %v507_v22 = vpack.c.bf16 %v581_v20, %v580_v16  ;;  %v527_v23 = vpack.c.bf16 %v589_v21, %v588_v17  ;;  %v242_v24 = vpop.f32.mrb[3].mxu0  ;;  %v274_v25 = vpop.f32.mrb[3].mxu1 }
 0x11e   :  { %v502_v26 = vpack.c.bf16 %v242_v24, %v239_v18  ;;  %v522_v27 = vpack.c.bf16 %v274_v25, %v271_v19 }
 0x11f   :  { %539 = vst [vmem:[#allocation8 + $0x8] sm:$0xff] %v507_v22   ;;  %543 = vst [vmem:[#allocation8 + $0x28] sm:$0xff] %v527_v23  }
 0x120   :  { %503 = vst [vmem:[#allocation8] sm:$0xff] %v502_v26   ;;  %542 = vst [vmem:[#allocation8 + $0x20] sm:$0xff] %v522_v27  }
 0x122   :  { %v584_v28 = vpop.f32.mrb[4].mxu0  ;;  %v592_v29 = vpop.f32.mrb[4].mxu1 }
 0x123   :  { %v255_v30 = vpop.f32.mrb[5].mxu0  ;;  %v287_v31 = vpop.f32.mrb[5].mxu1 }
 0x124   :  { %v585_v32 = vpop.f32.mrb[6].mxu0  ;;  %v593_v33 = vpop.f32.mrb[6].mxu1 }
 0x125   :  { %v517_v34 = vpack.c.bf16 %v585_v32, %v584_v28  ;;  %v537_v35 = vpack.c.bf16 %v593_v33, %v592_v29  ;;  %v258_v36 = vpop.f32.mrb[7].mxu0  ;;  %v290_v37 = vpop.f32.mrb[7].mxu1 }
 0x126   :  { %v512_v38 = vpack.c.bf16 %v258_v36, %v255_v30  ;;  %v532_v39 = vpack.c.bf16 %v290_v37, %v287_v31 }
 0x127   :  { %541 = vst [vmem:[#allocation8 + $0x18] sm:$0xff] %v517_v34   ;;  %545 = vst [vmem:[#allocation8 + $0x38] sm:$0xff] %v537_v35  }
 0x128   :  { %540 = vst [vmem:[#allocation8 + $0x10] sm:$0xff] %v512_v38   ;;  %544 = vst [vmem:[#allocation8 + $0x30] sm:$0xff] %v532_v39  }
 0x129   :  { %686 = shalt.err (!%p683_p6)
}
 0x12a   :  { %s687_s10 = scalar_lea.hbm %s770_s2, 1024 }
 0x12b   :  { %p688_p7 = scmp.ne.s32.totalorder %s770_s2, %s687_s10  ;;  %p691_p8 = scmp.lt.u32.totalorder %s687_s10, %s770_s2 }
 0x12d   :  { %p693_p9 = pnand %p691_p8, %p688_p7 }
 0x12f   :  { %696 = shalt.err (!%p693_p9)
}
 0x130   :  { %444 = dma.vmem_to_hbm [thread:$0]  %s439_s6, 1024, %s770_s2, [#allocation5], %s704_s19, %s704_s19, %s705_s20  }
 0x131   :  { %701 = dma.done.wait [#allocation5], 1024  }
 0x132   :  { %702 = vsyncadd [#allocation5], 4294966272 }
 0x133   :  { %448 = vsyncpa [#allocation4], 1 }
 0x134   :  { %449 = vsyncpa [#allocation7], 1 }
 0x135   :  { %450 = vsyncpa [#allocation5], 1 }

</bundles_post_ra>
